<compile_context>
chip_gen: v7x
topology: tpu7x:2x2x1
jax: 0.10.0
libtpu: 0.0.40
codegen_flags: <defaults>
</compile_context>

<pallas_src>
import jax
import jax.numpy as jnp
from jax import lax
from jax.experimental import pallas as pl
from jax.experimental.pallas import tpu as pltpu

FILTER_H, FILTER_W = 2, 3     # filter_size=(2, 3)
STRIDE_H, STRIDE_W = 2, 2     # the only stride for which output_padding=1 is valid
OUTPUT_PADDING = 1


def _dsd_kernel(x_ref, w_ref, b_ref, o_ref):
    # x_ref: (bn, th, W, Cin)            activations (compute dtype, e.g. bf16)
    # w_ref: (2*Cin, KH*2*Cp)            fused weights: rows [0:Cin] multiply x[a,b],
    #                                    rows [Cin:2Cin] multiply the W-shifted x[a,b+1];
    #                                    per-kh column block = [even cols | odd cols].
    # b_ref: (1, KH*2*Cp)                bias replicated per (kh, col parity), f32
    # o_ref: (bn, th, KH, W, 2*Cp)       bf16 slab; row-major == (bn, 2*th, 2*W, Cp)
    bn, th, w, cin = x_ref.shape
    two_cp = o_ref.shape[-1]

    x = x_ref[...]                                            # (bn, th, w, cin)
    # W-shifted copy: x_next[..., b, :] = x[..., b+1, :], last column zero.
    # (An XLU pltpu.roll + iota mask would keep this off the ld/st slots, but
    # packed-bf16 sublane rotation is not reliably lowered, so the proven static
    # slice + concat is used; it only touches the small input tile, not the 4x
    # larger output.)
    x_next = jnp.concatenate(
        [x[:, :, 1:, :], jnp.zeros((bn, th, 1, cin), x.dtype)], axis=2)

    # Single fused MXU matmul per grid step: K = 2*Cin, N = KH*2*Cp.
    xcat = jnp.concatenate([x, x_next], axis=-1).reshape(bn * th * w, 2 * cin)
    acc = jnp.dot(xcat, w_ref[...], preferred_element_type=jnp.float32)
    val = (acc + b_ref[...]).astype(o_ref.dtype)              # bias once, in f32
    val = val.reshape(bn, th, w, FILTER_H * two_cp)

    # Lane slices at vreg (multiple-of-128) boundaries -> dense, unmasked stores.
    for kh in range(FILTER_H):                                # static, 2 iterations
        o_ref[:, :, kh, :, :] = val[..., kh * two_cp:(kh + 1) * two_cp]


def _per_step_vmem_bytes(bn, th, w, cin, cout_pad):
    """Per-grid-step VMEM estimate: double-buffered DMA tiles + in-kernel temps."""
    itm = jnp.dtype(jnp.bfloat16).itemsize
    m = bn * th * w
    in_tile = m * cin * itm
    out_tile = m * FILTER_H * 2 * cout_pad * itm
    w_tile = 2 * cin * FILTER_H * 2 * cout_pad * itm
    b_tile = FILTER_H * 2 * cout_pad * 4
    pipelined = 2 * (in_tile + out_tile + w_tile + b_tile)    # double buffering
    temporaries = (4 * in_tile                                # x, x_next, xcat(=2x)
                   + 2 * m * FILTER_H * 2 * cout_pad * 4      # f32 acc + biased value
                   + out_tile)                                # bf16 cast before store
    return pipelined + temporaries


def _pick_tiles(n, h, fits, min_steps=4):
    """Pick (bn, th) dividing (n, h): biggest tile that fits the budget, preferring
    >= min_steps grid steps so DMA is hidden and both v7x TensorCores get work."""
    divs = lambda v: [d for d in range(1, v + 1) if v % d == 0]
    fitting = [(bn, th) for bn in divs(n) for th in divs(h) if fits(bn, th)]
    if not fitting:
        return 1, 1     # smallest tile; rely on the vmem_limit headroom
    steps = lambda bn, th: (n // bn) * (h // th)
    for ms in (min_steps, 2, 1):
        pref = [c for c in fitting if steps(*c) >= ms]
        if pref:
            return max(pref, key=lambda c: c[0] * c[1])
    return max(fitting, key=lambda c: c[0] * c[1])


def down_shifted_deconv2d(x, weight_iohw, bias, *,
                          filter_size=(FILTER_H, FILTER_W),
                          stride=(STRIDE_H, STRIDE_W),
                          compute_dtype=jnp.bfloat16,
                          data_format="NCHW"):
    """Forward pass of down_shifted_deconv2d.

    x:           (N, Cin, H, W) if data_format=="NCHW" else (N, H, W, Cin)
    weight_iohw: (Cin, Cout, 2, 3)   -- PyTorch ConvTranspose2d weight layout
    bias:        (Cout,)
    returns:     (N, Cout, 2H, 2W)   (or NHWC) -- deconv(x) cropped as in forward()

    Activations/weights are computed in `compute_dtype` (bf16 by default) with f32
    MXU accumulation; pass compute_dtype=jnp.float32 for exact f32 numerics.
    Callers that already hold NHWC activations should pass data_format="NHWC" to
    skip both layout transposes (each is a full HBM round trip).
    """
    if tuple(filter_size) != (FILTER_H, FILTER_W) or tuple(stride) != (STRIDE_H, STRIDE_W):
        # TODO(synk): only the PixelCNN++ configuration filter_size=(2,3), stride=(2,2)
        # is implemented (output_padding=1 is invalid in PyTorch for stride=(1,1)).
        raise NotImplementedError("only filter_size=(2,3), stride=(2,2) is supported")

    out_dtype = x.dtype
    if data_format == "NCHW":
        n, cin, h, w = x.shape
        x_nhwc = jnp.transpose(x, (0, 2, 3, 1)).astype(compute_dtype)
    elif data_format == "NHWC":
        n, h, w, cin = x.shape
        x_nhwc = x.astype(compute_dtype)
    else:
        raise ValueError("data_format must be 'NCHW' or 'NHWC'")
    cout = weight_iohw.shape[1]
    cout_pad = -(-cout // 64) * 64            # 2*cout_pad is a multiple of 128

    # --- glue: weight repacking into the fused (2*Cin, KH*2*Cp) matrix ------------
    wt = jnp.transpose(weight_iohw, (2, 3, 0, 1)).astype(compute_dtype)  # (KH,KW,Cin,Cout)
    padc = lambda m: jnp.pad(m, ((0, 0), (0, cout_pad - cout)))
    zeros_cp = jnp.zeros((cin, cout_pad), compute_dtype)
    blocks = []
    for kh in range(FILTER_H):
        top = jnp.concatenate([padc(wt[kh, 1]), padc(wt[kh, 2])], axis=-1)  # x[a,b]
        bot = jnp.concatenate([zeros_cp,        padc(wt[kh, 0])], axis=-1)  # x[a,b+1]
        blocks.append(jnp.concatenate([top, bot], axis=0))                  # (2Cin, 2Cp)
    wfull = jnp.concatenate(blocks, axis=-1)                                # (2Cin, KH*2Cp)

    bias_p = jnp.pad(bias.astype(jnp.float32), (0, cout_pad - cout))        # (Cp,)
    bias_full = jnp.tile(jnp.concatenate([bias_p, bias_p]), (FILTER_H,)).reshape(1, -1)

    # --- tiling: batch + H grid, budgeted against VMEM (incl. temporaries) --------
    budget = 12 * 1024 * 1024                 # well under v7x's 32 MiB scoped default
    fits = lambda bn, th: _per_step_vmem_bytes(bn, th, w, cin, cout_pad) <= budget
    bn, th = _pick_tiles(n, h, fits)

    out6 = pl.pallas_call(
        _dsd_kernel,
        out_shape=jax.ShapeDtypeStruct((n, h, FILTER_H, w, 2 * cout_pad), compute_dtype),
        grid=(n // bn, h // th),
        in_specs=[
            pl.BlockSpec((bn, th, w, cin), lambda i, j: (i, j, 0, 0)),
            # Constant index_maps keep the (small) weights and bias resident in VMEM.
            pl.BlockSpec((2 * cin, FILTER_H * 2 * cout_pad), lambda i, j: (0, 0)),
            pl.BlockSpec((1, FILTER_H * 2 * cout_pad), lambda i, j: (0, 0)),
        ],
        out_specs=pl.BlockSpec((bn, th, FILTER_H, w, 2 * cout_pad),
                               lambda i, j: (i, j, 0, 0, 0)),
        compiler_params=pltpu.CompilerParams(
            dimension_semantics=("parallel", "parallel"),
            vmem_limit_bytes=32 * 1024 * 1024),   # <= scoped default on v5e/v6e/v7x
    )(x_nhwc, wfull, bias_full)

    # (N, H, 2, W, 2*Cp) --row-major--> (N, 2H, 2W, Cp): free reshape.  The channel
    # crop, NHWC->NCHW transpose and cast back to the input dtype fuse into one op.
    out_nhwc = out6.reshape(n, 2 * h, 2 * w, cout_pad)
    if data_format == "NCHW":
        return jnp.transpose(out_nhwc[..., :cout], (0, 3, 1, 2)).astype(out_dtype)
    return out_nhwc[..., :cout].astype(out_dtype)


def _reference(x_nchw, weight_iohw, bias, *, compute_dtype=jnp.float32):
    """Pure-JAX reference: ConvTranspose2d(stride=2, output_padding=1) + the crop."""
    kh, kw = FILTER_H, FILTER_W
    sh, sw = STRIDE_H, STRIDE_W
    op = OUTPUT_PADDING
    xc = x_nchw.astype(compute_dtype)
    # conv_transpose == conv over the stride-dilated input with the spatially flipped,
    # IO-swapped kernel and 'full' padding (+ output_padding on the bottom/right).
    w_oihw = jnp.transpose(weight_iohw, (1, 0, 2, 3))[:, :, ::-1, ::-1].astype(compute_dtype)
    full = lax.conv_general_dilated(
        xc, w_oihw, window_strides=(1, 1),
        padding=[(kh - 1, kh - 1 + op), (kw - 1, kw - 1 + op)],
        lhs_dilation=(sh, sw),
        dimension_numbers=("NCHW", "OIHW", "NCHW"),
        preferred_element_type=jnp.float32)
    full = full + bias.reshape(1, -1, 1, 1).astype(jnp.float32)
    hf, wf = full.shape[2], full.shape[3]
    # forward() crop: rows [:H_out - KH + 1], cols [(KW-1)//2 : W_out - (KW-1)//2]
    return full[:, :, :hf - kh + 1, (kw - 1) // 2: wf - (kw - 1) // 2]


if __name__ == "__main__":
    key = jax.random.PRNGKey(0)
    k_x, k_w, k_b = jax.random.split(key, 3)

    N, Cin, Cout, H, W = 2, 4, 8, 16, 16
    x = jax.random.normal(k_x, (N, Cin, H, W), jnp.float32)
    # PyTorch ConvTranspose2d weight layout: (Cin, Cout, KH, KW).
    # (weight_norm is an identity reparameterization at initialization.)
    weight = 0.1 * jax.random.normal(k_w, (Cin, Cout, FILTER_H, FILTER_W), jnp.float32)
    bias = 0.1 * jax.random.normal(k_b, (Cout,), jnp.float32)

    out = jax.block_until_ready(down_shifted_deconv2d(x, weight, bias))

    # Reference with the same bf16 rounding of inputs/weights/output, f32 accumulation.
    ref = _reference(x, weight, bias, compute_dtype=jnp.bfloat16)
    ref = ref.astype(jnp.bfloat16).astype(jnp.float32)   # match the bf16 output slab
    assert out.shape == (N, Cout, 2 * H, 2 * W), out.shape
    max_err = float(jnp.max(jnp.abs(out - ref)))
    assert jnp.allclose(out, ref, atol=1e-2, rtol=1e-2), max_err

    print("KERNEL_OK")
</pallas_src>

<mosaic_0001>
module attributes {stable_mosaic.version = 11 : i64} {
  func.func @_dsd_kernel(%arg0: i32, %arg1: i32, %arg2: memref<1x8x16x4xbf16, #tpu.memory_space<vmem>>, %arg3: memref<8x256xbf16, #tpu.memory_space<vmem>>, %arg4: memref<1x256xf32, #tpu.memory_space<vmem>>, %arg5: memref<1x8x2x16x128xbf16, #tpu.memory_space<vmem>>) attributes {dimension_semantics = [#tpu.dimension_semantics<parallel>, #tpu.dimension_semantics<parallel>], iteration_bounds = array<i64: 2, 2>, scalar_prefetch = 0 : i64, scratch_operands = 0 : i64, tpu.core_type = #tpu.core_type<tc>, window_params = [{transform_indices = @transform_0, window_bounds = array<i64: 1, 8, 16, 4>}, {pipeline_mode = #tpu.pipeline_mode<synchronous>, transform_indices = @transform_1, window_bounds = array<i64: 8, 256>}, {pipeline_mode = #tpu.pipeline_mode<synchronous>, transform_indices = @transform_2, window_bounds = array<i64: 1, 256>}, {transform_indices = @transform_3, window_bounds = array<i64: 1, 8, 2, 16, 128>}]} {
    %c0 = arith.constant 0 : index
    %c0_0 = arith.constant 0 : index
    %c0_1 = arith.constant 0 : index
    %c0_2 = arith.constant 0 : index
    %0 = vector.load %arg2[%c0, %c0_0, %c0_1, %c0_2] : memref<1x8x16x4xbf16, #tpu.memory_space<vmem>>, vector<1x8x16x4xbf16>
    %1 = vector.extract_strided_slice %0 {offsets = [0, 0, 1, 0], sizes = [1, 8, 15, 4], strides = [1, 1, 1, 1]} : vector<1x8x16x4xbf16> to vector<1x8x15x4xbf16>
    %cst = arith.constant 0.000000e+00 : bf16
    %2 = vector.broadcast %cst : bf16 to vector<1x8x1x4xbf16>
    %3 = tpu.concatenate %1, %2 in 2 : vector<1x8x15x4xbf16>, vector<1x8x1x4xbf16> -> vector<1x8x16x4xbf16>
    %4 = tpu.concatenate %0, %3 in 3 : vector<1x8x16x4xbf16>, vector<1x8x16x4xbf16> -> vector<1x8x16x8xbf16>
    %5 = vector.shape_cast %4 : vector<1x8x16x8xbf16> to vector<128x8xbf16>
    %c0_3 = arith.constant 0 : index
    %c0_4 = arith.constant 0 : index
    %6 = vector.load %arg3[%c0_3, %c0_4] : memref<8x256xbf16, #tpu.memory_space<vmem>>, vector<8x256xbf16>
    %cst_5 = arith.constant dense<0.000000e+00> : vector<128x256xf32>
    %7 = tpu.matmul %5, %6, %cst_5 {dimension_numbers = #tpu.dot_dimension_numbers<[1], [0], [0], [1], [0, 0, 1, 1], [], []>} : vector<128x8xbf16>, vector<8x256xbf16>, vector<128x256xf32> -> vector<128x256xf32>
    %c0_6 = arith.constant 0 : index
    %c0_7 = arith.constant 0 : index
    %8 = vector.load %arg4[%c0_6, %c0_7] : memref<1x256xf32, #tpu.memory_space<vmem>>, vector<1x256xf32>
    %9 = vector.broadcast %8 : vector<1x256xf32> to vector<128x256xf32>
    %10 = arith.addf %7, %9 : vector<128x256xf32>
    %11 = arith.truncf %10 : vector<128x256xf32> to vector<128x256xbf16>
    %12 = vector.shape_cast %11 : vector<128x256xbf16> to vector<1x8x16x256xbf16>
    %13 = vector.extract_strided_slice %12 {offsets = [0, 0, 0, 0], sizes = [1, 8, 16, 128], strides = [1, 1, 1, 1]} : vector<1x8x16x256xbf16> to vector<1x8x16x128xbf16>
    %c0_8 = arith.constant 0 : index
    %c0_9 = arith.constant 0 : index
    %c0_10 = arith.constant 0 : index
    %c0_11 = arith.constant 0 : index
    %c0_12 = arith.constant 0 : index
    %14 = vector.load %arg5[%c0_8, %c0_9, %c0_10, %c0_11, %c0_12] : memref<1x8x2x16x128xbf16, #tpu.memory_space<vmem>>, vector<1x8x1x16x128xbf16>
    %15 = vector.shape_cast %14 : vector<1x8x1x16x128xbf16> to vector<1x8x16x128xbf16>
    %16 = vector.shape_cast %13 : vector<1x8x16x128xbf16> to vector<1x8x1x16x128xbf16>
    tpu.vector_store %arg5[%c0_8, %c0_9, %c0_10, %c0_11, %c0_12], %16 {strides = array<i32>} : memref<1x8x2x16x128xbf16, #tpu.memory_space<vmem>>, vector<1x8x1x16x128xbf16>,
    %17 = vector.extract_strided_slice %12 {offsets = [0, 0, 0, 128], sizes = [1, 8, 16, 128], strides = [1, 1, 1, 1]} : vector<1x8x16x256xbf16> to vector<1x8x16x128xbf16>
    %c0_13 = arith.constant 0 : index
    %c0_14 = arith.constant 0 : index
    %c1 = arith.constant 1 : index
    %c0_15 = arith.constant 0 : index
    %c0_16 = arith.constant 0 : index
    %18 = vector.load %arg5[%c0_13, %c0_14, %c1, %c0_15, %c0_16] : memref<1x8x2x16x128xbf16, #tpu.memory_space<vmem>>, vector<1x8x1x16x128xbf16>
    %19 = vector.shape_cast %18 : vector<1x8x1x16x128xbf16> to vector<1x8x16x128xbf16>
    %20 = vector.shape_cast %17 : vector<1x8x16x128xbf16> to vector<1x8x1x16x128xbf16>
    tpu.vector_store %arg5[%c0_13, %c0_14, %c1, %c0_15, %c0_16], %20 {strides = array<i32>} : memref<1x8x2x16x128xbf16, #tpu.memory_space<vmem>>, vector<1x8x1x16x128xbf16>,
    return
  }
  func.func @transform_0(%arg0: i32, %arg1: i32) -> (i32, i32, i32, i32) {
    %c0_i32 = arith.constant 0 : i32
    %c0_i32_0 = arith.constant 0 : i32
    %c0_i32_1 = arith.constant 0 : i32
    return %arg0, %arg1, %c0_i32, %c0_i32_0 : i32, i32, i32, i32
  }
  func.func @transform_1(%arg0: i32, %arg1: i32) -> (i32, i32) {
    %c0_i32 = arith.constant 0 : i32
    %c0_i32_0 = arith.constant 0 : i32
    %c0_i32_1 = arith.constant 0 : i32
    return %c0_i32, %c0_i32_0 : i32, i32
  }
  func.func @transform_2(%arg0: i32, %arg1: i32) -> (i32, i32) {
    %c0_i32 = arith.constant 0 : i32
    %c0_i32_0 = arith.constant 0 : i32
    %c0_i32_1 = arith.constant 0 : i32
    return %c0_i32, %c0_i32_0 : i32, i32
  }
  func.func @transform_3(%arg0: i32, %arg1: i32) -> (i32, i32, i32, i32, i32) {
    %c0_i32 = arith.constant 0 : i32
    %c0_i32_0 = arith.constant 0 : i32
    %c0_i32_1 = arith.constant 0 : i32
    %c0_i32_2 = arith.constant 0 : i32
    return %arg0, %arg1, %c0_i32, %c0_i32_0, %c0_i32_1 : i32, i32, i32, i32, i32
  }
}

</mosaic_0001>

<bundles_post_ra>
// kernel: tpu_custom_call.1
= control target key start
LH: loop header
LB: loop body
LE: loop exit
PB: predicated region body
PF: predicated region fallthrough
CT: control target
= control target key end

     0   :  { %8 = vsyncpa [#allocation3], 0  ;;  %s1509_s0 = inlined_call_operand.vmem [shape: bf16[2,16,16,4], index: 0, kind: input, shape index: {}]   ;;  %s1510_s1 = inlined_call_operand.vmem [shape: bf16[8,256], index: 1, kind: input, shape index: {}]   ;;  %s1511_s2 = inlined_call_operand.vmem [shape: f32[1,256], index: 2, kind: input, shape index: {}]   ;;  %s1512_s3 = inlined_call_operand.hbm [shape: bf16[2,16,2,16,128], index: 3, kind: output, shape index: {}]  }
   0x1   :  { %10 = vsyncpa [#allocation3 + $0x1], 0  ;;  %s1212_s12 = smov 0   ;;  %s1214_s13 = smov 0  }
   0x2   :  { %s1216_s14 = smov 0   ;;  %s1218_s15 = smov 0  }
   0x3   :  { %s1220_s16 = smov 0   ;;  %s1222_s17 = smov 0  }
   0x4   :  { %s1224_s18 = smov 0   ;;  %s1226_s19 = smov 0  }
   0x5 LB: > { %s794_s20 = sadd.s32 4294967295, %s1186_s19   ;;  %s795_s21 = sadd.s32 4294967294, %s1186_s19   ;;  %s1186_s19 = sphi %s1226_s19, %s16_s19   ;;  %s1182_s18 = sphi %s1224_s18, %s1523_s18   ;;  %s1178_s17 = sphi %s1222_s17, %s1522_s17   ;;  %s1174_s16 = sphi %s1220_s16, %s1521_s16   ;;  %s1170_s15 = sphi %s1218_s15, %s1520_s15   ;;  %s1166_s14 = sphi %s1216_s14, %s1519_s14   ;;  %s1162_s13 = sphi %s1214_s13, %s1518_s13   ;;  %s1158_s12 = sphi %s1212_s12, %s1517_s12  }
   0x6   : > { %s25_s22 = sadd.s32 1, %s1178_s17  ;;  %s28_s23 = sadd.s32 1, %s1182_s18 }
   0x7   : > { %p26_p0 = scmp.ge.s32.totalorder %s25_s22, 2  ;;  %p117_p1 = scmp.ne.s32.totalorder %s1166_s14, %s1162_s13 }
   0x8   : > { %p118_p2 = scmp.eq.s32.totalorder %s794_s20, 3  ;;  %p123_p5 = scmp.ne.s32.totalorder %s1162_s13, %s1158_s12 }
   0x9   : > { %s1525_s22 = smov (%p26_p0, %s25_s22), 0  ;;  %s1527_s23 = smov (!%p26_p0, %s28_s23), %s1182_s18 }
   0xa   : > { %s103_s24 = ssub.s32 %s1178_s17, %s1525_s22  ;;  %p1263_p3 = por %p118_p2, %p117_p1 }
   0xb   : > { %p30_p4 = scmp.ge.s32.totalorder %s1527_s23, 2  ;;  %p124_p6 = scmp.eq.s32.totalorder %s795_s21, 3 }
   0xc   : > { %p798_p7 = scmp.ge.s32.totalorder %s1186_s19, 1  ;;  %p162_p9 = scmp.lt.s32.totalorder %s1186_s19, 5 }
   0xd   : > { %s1529_s23 = smov (%p30_p4, %s1527_s23), 0  ;;  %p1272_p8 = por %p124_p6, %p123_p5 }
   0xe   : > { %s102_s27 = ssub.s32 %s1182_s18, %s1529_s23  ;;  %s107_s28 = sadd.s32 1, %s1166_s14 }
   0xf   : > { %s104_s29 = sor.u32 %s103_s24, %s102_s27  ;;  %p163_p10 = pnand %p798_p7, %p162_p9 }
  0x10   : > { %p105_p11 = scmp.eq.s32.totalorder %s104_s29, 0  ;;  %s800_s4 = sshll.u32 (!%p163_p10), %s1170_s15, 3  ;;  %v376_v0 = vld [vmem:[%s1510_s1] sm:$0xff] (!%p163_p10)  ;;  %vm411_vm0 = vcmask (!%p163_p10), 1043456   ;;  %v1188_v4 = vmov (!%p163_p10), 0   ;;  %vm324_vm2 = vcmask (!%p163_p10), 1047552  }
  0x11   : > { %166 = sbr.rel (%p163_p10) target bundleno = 416 (0x1a0), region = 32  ;;  %p192_p12 = scmp.lt.s32.totalorder (!%p163_p10), %s1174_s16, 1  ;;  %v813_v1 = vcombine.high (!%p163_p10), %v376_v0, %v376_v0  ;;  %v812_v2 = vcombine.low (!%p163_p10), %v376_v0, %v376_v0  ;;  %450 = vmatprep.mubr.bf16.mxu0 (!%p163_p10), %v1188_v4  ;;  %490 = vmatprep.mubr.bf16.mxu1 (!%p163_p10), %v1188_v4  ;;  %vm325_vm1 = vsmask.f32 (!%p163_p10), 7424  ;;  %vm359_vm4 = vcmask (!%p163_p10), 31744  }
  0x12   : > { %s1281_s30 = scalar_select %p105_p11, %s1166_s14, %s107_s28  }
  0x13   : > { %p194_p13 = scmp.lt.s32.totalorder (!%p163_p10), %s800_s4, 15  ;;  %814 = vmatprep.subr.msk.bf16.mxu0 (!%p163_p10), %vm411_vm0, %v813_v1  ;;  %v413_v3 = vsel (!%p163_p10), %vm411_vm0, %v812_v2, 0  ;;  %1006 = vmatprep.subr.msk.bf16.mxu1 (!%p163_p10), %vm411_vm0, %v813_v1  ;;  %vm1315_vm3 = vmand (!%p163_p10), %vm324_vm2, %vm325_vm1  ;;  %s1189_s27 = smov (!%p163_p10), 4   ;;  %vm394_vm5 = vcmask (!%p163_p10), 64512  }
  0x14   : > { %419 = vmatpush1.bf16.msra.mxu0 (!%p163_p10), %v413_v3  ;;  %1007 = vmatpush1.bf16.msra.mxu1 (!%p163_p10), %v413_v3  ;;  %s1190_s28 = smov (!%p163_p10), [#allocation2]  }
  0x15   : > { %s1096_s29 = sshll.u32 (!%p163_p10), %s1190_s28, 4  ;;  %s1097_s29 = int_to_ptr.vmem [resolvable:$false] %s1096_s29 }
  0x18   : > { %s193_s7 = scalar_select %p192_p12, %s1174_s16, 1 }
  0x19   : > { %s1531_s4 = smov (!%p194_p13, %s800_s4), 15 }
  0x1a   : > { %s802_s8 = sshll.u32 %s193_s7, 5  ;;  %s801_s9 = sshll.u32 %s1531_s4, 1 }
  0x1b   : > { %s198_s10 = sadd.s32 %s802_s8, %s801_s9  ;;  %s188_s4 = sand.u32 1, %s1162_s13  }
  0x1c   : > { %s803_s11 = sshll.u32 %s198_s10, 2  ;;  %s799_s5 = sshll.u32 %s188_s4, 7 }
  0x1d   : > { %s1294_s24 = scalar_lea.vmem %s1509_s0, %s803_s11  ;;  %s1398_s6 = scalar_lea.vmem [#allocation2], %s799_s5 }
  0x1e   : > { %v1297_v5 = vld [vmem:[%s1294_s24] sm:$0xff]   ;;  %v1307_v11 = vld [vmem:[%s1294_s24 + $0x8] sm:$0xff]   ;;  %v1313_v14 = vld [vmem:[%s1294_s24 + $0x10] sm:$0xff]   ;;  %s910_s7 = sshll.u32 %s1170_s15, 5  ;;  %s874_s8 = sshll.u32 %s1174_s16, 6 }
  0x1f   : > { %v1300_v6 = vld [vmem:[%s1294_s24 + $0x20] sm:$0xff]   ;;  %v261_v7 = vshrl.u32 %v1297_v5, 16  ;;  %v263_v8 = vshll.u32 %v1297_v5, 16  ;;  %v1310_v12 = vld [vmem:[%s1294_s24 + $0x28] sm:$0xff]   ;;  %v268_v17 = vshrl.u32 %v1307_v11, 16  ;;  %v270_v18 = vshll.u32 %v1307_v11, 16  ;;  %s706_s9 = sadd.s32 %s910_s7, %s874_s8 }
  0x20   : > { %v289_v9 = vshrl.u32 %v1300_v6, 16  ;;  %v291_v10 = vshll.u32 %v1300_v6, 16  ;;  %v296_v19 = vshrl.u32 %v1310_v12, 16  ;;  %v298_v21 = vshll.u32 %v1310_v12, 16  ;;  %v1087_v24 = vld [vmem:[%s1294_s24 + $0x30] sm:$0xff]   ;;  %v1327_v27 = vld [vmem:[%s1294_s24 + $0x18] sm:$0xff]  }
  0x21   : > { %v265_v13 = vrot.slane %v263_v8, 1  ;;  %v275_v22 = vshrl.u32 %v1313_v14, 16  ;;  %v277_v23 = vshll.u32 %v1313_v14, 16  ;;  %v272_v26 = vrot.slane %v270_v18, 1  ;;  %v1089_v35 = vld [vmem:[%s1294_s24 + $0x38] sm:$0xff]   ;;  %s875_s15 = sshll.u32 %s706_s9, 6 }
  0x22   : > { %v293_v16 = vrot.slane %v291_v10, 1  ;;  %v300_v29 = vrot.slane %v298_v21, 1  ;;  %v303_v33 = vshrl.u32 %v1087_v24, 16  ;;  %v305_v34 = vshll.u32 %v1087_v24, 16  ;;  %v377_v10 = vld [vmem:[%s1511_s2] sm:$0x3]  ;;  %s1448_s20 = scalar_lea.hbm %s1512_s3, %s875_s15 }
  0x23   : > { %v266_v20 = vor.u32 %v265_v13, %v261_v7  ;;  %v279_v30 = vrot.slane %v277_v23, 1  ;;  %v273_v32 = vor.u32 %v272_v26, %v268_v17  ;;  %v282_v38 = vshrl.u32 %v1327_v27, 16  ;;  %s709_s16 = sshll.u32 %s1398_s6, 4  ;;  %s1456_s21 = scalar_lea.sflag [#allocation3], %s188_s4  ;;  %s1450_s16 = int_to_ptr.vmem [resolvable:$true] %s709_s16 }
  0x24   : > { %v294_v25 = vor.u32 %v293_v16, %v289_v9  ;;  %v301_v36 = vor.u32 %v300_v29, %v296_v19  ;;  %v284_v39 = vshll.u32 %v1327_v27, 16  ;;  %v307_v41 = vrot.slane %v305_v34, 1  ;;  %s1092_s24 = scalar_lea.vmem %s1450_s16, 2048  ;;  %s1098_s5 = scalar_lea.vmem %s1097_s29, 4096 }
  0x25   : > { %v327_v28 = vsel %vm1315_vm3, %v266_v20, 0  ;;  %v280_v37 = vor.u32 %v279_v30, %v275_v22  ;;  %v328_v40 = vsel %vm1315_vm3, %v273_v32, 0  ;;  %v312_v42 = vshll.u32 %v1089_v35, 16  ;;  %p1093_p0 = scmp.ne.s32.totalorder %s1450_s16, %s1092_s24  ;;  %p1099_p4 = scmp.lt.s32.totalorder %s1450_s16, %s1097_s29 }
  0x26   : > { %343 = vrot.lane.b32.xlu0 %v327_v28, %s1189_s27  ;;  %v331_v31 = vsel %vm1315_vm3, %v294_v25, 0  ;;  %345 = vrot.lane.b32.xlu1 %v328_v40, %s1189_s27  ;;  %v286_v43 = vrot.slane %v284_v39, 1  ;;  %v332_v44 = vsel %vm1315_vm3, %v301_v36, 0  ;;  %v308_v45 = vor.u32 %v307_v41, %v303_v33  ;;  %p1100_p5 = scmp.lt.s32.totalorder %s1098_s5, %s1092_s24 }
  0x27   : > { %v310_v46 = vshrl.u32 %v1089_v35, 16  ;;  %v314_v47 = vrot.slane %v312_v42, 1  ;;  %v329_v48 = vsel %vm1315_vm3, %v280_v37, 0  ;;  %v379_v7 = vlaneseq  ;;  %p1094_p1 = pnand %p1093_p0, %p1263_p3 }
  0x28   : > { %v287_v49 = vor.u32 %v286_v43, %v282_v38  ;;  %v333_v50 = vsel %vm1315_vm3, %v308_v45, 0  ;;  %p1101_p6 = por %p1100_p5, %p1099_p4 }
  0x29   : > { %v315_v51 = vor.u32 %v314_v47, %v310_v46  ;;  %v380_v8 = vshrl.u32 %v379_v7, 7  ;;  %p1095_p2 = pneg %p1094_p1 }
  0x2a   : > { %351 = vrot.lane.b32.xlu0 %v331_v31, %s1189_s27  ;;  %353 = vrot.lane.b32.xlu1 %v332_v44, %s1189_s27  ;;  %v330_v52 = vsel %vm1315_vm3, %v287_v49, 0 }
  0x2b   : > { %v334_v53 = vsel %vm1315_vm3, %v315_v51, 0  ;;  %v381_v9 = vsub.s32 0, %v380_v8  ;;  %p1102_p7 = pnand %p1101_p6, %p1095_p2 }
  0x2e   : > { %347 = vrot.lane.b32.xlu0 %v329_v48, %s1189_s27  ;;  %355 = vrot.lane.b32.xlu1 %v333_v50, %s1189_s27 }
  0x32   : > { %349 = vrot.lane.b32.xlu0 %v330_v52, %s1189_s27  ;;  %357 = vrot.lane.b32.xlu1 %v334_v53, %s1189_s27 }
  0x98   : > { %v344_v54 = vpop.permute.xlu0 %343  ;;  %v346_v56 = vpop.permute.xlu1 %345 }
  0x99   : > { %v361_v55 = vsel %vm359_vm4, %v1297_v5, %v344_v54  ;;  %v363_v59 = vsel %vm359_vm4, %v1307_v11, %v346_v56  ;;  %v385_v11 = vsub.s32 1, %v380_v8 }
  0x9a   : > { %815 = vmatmul.mubr.msk.bf16.vlgmr.msra.gmra.mrb[0].mxu0 %vm394_vm5, %v361_v55 }
  0x9b   : > { %460 = vmatprep.mubr.bf16.mxu0 %v1188_v4 }
  0x9c   : > { %v352_v57 = vpop.permute.xlu0 %351  ;;  %v354_v60 = vpop.permute.xlu1 %353 }
  0x9d   : > { %v369_v58 = vsel %vm359_vm4, %v1300_v6, %v352_v57  ;;  %v371_v61 = vsel %vm359_vm4, %v1310_v12, %v354_v60  ;;  %v1388_v12 = vrot.slane %v377_v10, %v381_v9 }
  0x9e   : > { %819 = vmatmul.mubr.msk.bf16.vlgmr.msra.gmra.mrb[0].mxu1 %vm394_vm5, %v369_v58 }
  0x9f   : > { %500 = vmatprep.mubr.bf16.mxu1 %v1188_v4 }
  0xa0   : > { %v348_v62 = vpop.permute.xlu0 %347  ;;  %v356_v0 = vpop.permute.xlu1 %355 }
  0xa1   : > { %v365_v63 = vsel %vm359_vm4, %v1313_v14, %v348_v62  ;;  %v373_v1 = vsel %vm359_vm4, %v1087_v24, %v356_v0 }
  0xa2   : > { %816 = vmatmul.mubr.msk.bf16.gmra.mrb[4].mxu0 %vm394_vm5, %v363_v59 }
  0xa3   : > { %470 = vmatprep.mubr.bf16.mxu0 %v1188_v4 }
  0xa4   : > { %v350_v2 = vpop.permute.xlu0 %349  ;;  %v358_v5 = vpop.permute.xlu1 %357 }
  0xa5   : > { %v367_v3 = vsel %vm359_vm4, %v1327_v27, %v350_v2  ;;  %v375_v6 = vsel %vm359_vm4, %v1089_v35, %v358_v5 }
  0xa6   : > { %820 = vmatmul.mubr.msk.bf16.gmra.mrb[4].mxu1 %vm394_vm5, %v371_v61 }
  0xa7   : > { %510 = vmatprep.mubr.bf16.mxu1 %v1188_v4 }
  0xaa   : > { %817 = vmatmul.mubr.msk.bf16.gmra.mrb[8].mxu0 %vm394_vm5, %v365_v63 }
  0xab   : > { %480 = vmatprep.mubr.bf16.mxu0 %v1188_v4 }
  0xae   : > { %821 = vmatmul.mubr.msk.bf16.gmra.mrb[8].mxu1 %vm394_vm5, %v373_v1 }
  0xaf   : > { %520 = vmatprep.mubr.bf16.mxu1 %v1188_v4  ;;  %v1390_v4 = vrot.slane %v377_v10, %v385_v11 }
  0xb2   : > { %818 = vmatmul.mubr.msk.bf16.gmra.mrb[12].mxu0 %vm394_vm5, %v367_v3 }
  0xb6   : > { %822 = vmatmul.mubr.msk.bf16.gmra.mrb[12].mxu1 %vm394_vm5, %v375_v6 }
 0x16d   : > { %v452_v13 = vpop.f32.mrb[0].mxu0 }
 0x16e   : > { %v454_v14 = vpop.f32.mrb[1].mxu0  ;;  %v453_v16 = vadd.f32 %v452_v13, %v1388_v12 }
 0x16f   : > { %v456_v15 = vpop.f32.mrb[2].mxu0  ;;  %v455_v19 = vadd.f32 %v454_v14, %v1390_v4 }
 0x170   : > { %v457_v17 = vadd.f32 %v456_v15, %v1388_v12  ;;  %v458_v18 = vpop.f32.mrb[3].mxu0 }
 0x171   : > { %v459_v20 = vadd.f32 %v458_v18, %v1390_v4  ;;  %v492_v21 = vpop.f32.mrb[0].mxu1 }
 0x172   : > { %v914_v22 = vpack.c.bf16 %v457_v17, %v453_v16  ;;  %v494_v23 = vpop.f32.mrb[1].mxu1  ;;  %v493_v26 = vadd.f32 %v492_v21, %v1388_v12 }
 0x173   : > { %v954_v24 = vpack.c.bf16 %v459_v20, %v455_v19  ;;  %v496_v25 = vpop.f32.mrb[2].mxu1  ;;  %v495_v29 = vadd.f32 %v494_v23, %v1390_v4 }
 0x174   : > { %915 = vst [vmem:[%s1398_s6] sm:$0xff] %v914_v22   ;;  %v497_v27 = vadd.f32 %v496_v25, %v1388_v12  ;;  %v498_v28 = vpop.f32.mrb[3].mxu1 }
 0x175   : > { %998 = vst [vmem:[%s1398_s6 + $0x8] sm:$0xff] %v954_v24   ;;  %v499_v30 = vadd.f32 %v498_v28, %v1390_v4  ;;  %v462_v31 = vpop.f32.mrb[4].mxu0 }
 0x176   : > { %v934_v32 = vpack.c.bf16 %v497_v27, %v493_v26  ;;  %v464_v33 = vpop.f32.mrb[5].mxu0  ;;  %v463_v36 = vadd.f32 %v462_v31, %v1388_v12 }
 0x177   : > { %v974_v34 = vpack.c.bf16 %v499_v30, %v495_v29  ;;  %v466_v35 = vpop.f32.mrb[6].mxu0  ;;  %v465_v39 = vadd.f32 %v464_v33, %v1390_v4 }
 0x178   : > { %994 = vst [vmem:[%s1398_s6 + $0x40] sm:$0xff] %v934_v32   ;;  %v467_v37 = vadd.f32 %v466_v35, %v1388_v12  ;;  %v468_v38 = vpop.f32.mrb[7].mxu0 }
 0x179   : > { %1002 = vst [vmem:[%s1398_s6 + $0x48] sm:$0xff] %v974_v34   ;;  %v469_v40 = vadd.f32 %v468_v38, %v1390_v4  ;;  %v502_v41 = vpop.f32.mrb[4].mxu1 }
 0x17a   : > { %v919_v42 = vpack.c.bf16 %v467_v37, %v463_v36  ;;  %v504_v43 = vpop.f32.mrb[5].mxu1  ;;  %v503_v46 = vadd.f32 %v502_v41, %v1388_v12 }
 0x17b   : > { %v959_v44 = vpack.c.bf16 %v469_v40, %v465_v39  ;;  %v506_v45 = vpop.f32.mrb[6].mxu1  ;;  %v505_v49 = vadd.f32 %v504_v43, %v1390_v4 }
 0x17c   : > { %991 = vst [vmem:[%s1398_s6 + $0x10] sm:$0xff] %v919_v42   ;;  %v507_v47 = vadd.f32 %v506_v45, %v1388_v12  ;;  %v508_v48 = vpop.f32.mrb[7].mxu1 }
 0x17d   : > { %999 = vst [vmem:[%s1398_s6 + $0x18] sm:$0xff] %v959_v44   ;;  %v509_v50 = vadd.f32 %v508_v48, %v1390_v4  ;;  %v472_v51 = vpop.f32.mrb[8].mxu0 }
 0x17e   : > { %v939_v52 = vpack.c.bf16 %v507_v47, %v503_v46  ;;  %v473_v53 = vadd.f32 %v472_v51, %v1388_v12  ;;  %v474_v54 = vpop.f32.mrb[9].mxu0 }
 0x17f   : > { %v979_v55 = vpack.c.bf16 %v509_v50, %v505_v49  ;;  %v475_v56 = vadd.f32 %v474_v54, %v1390_v4  ;;  %v476_v57 = vpop.f32.mrb[10].mxu0 }
 0x180   : > { %995 = vst [vmem:[%s1398_s6 + $0x50] sm:$0xff] %v939_v52   ;;  %v477_v58 = vadd.f32 %v476_v57, %v1388_v12  ;;  %v478_v59 = vpop.f32.mrb[11].mxu0 }
 0x181   : > { %1003 = vst [vmem:[%s1398_s6 + $0x58] sm:$0xff] %v979_v55   ;;  %v479_v60 = vadd.f32 %v478_v59, %v1390_v4  ;;  %v512_v61 = vpop.f32.mrb[8].mxu1 }
 0x182   : > { %v924_v62 = vpack.c.bf16 %v477_v58, %v473_v53  ;;  %v514_v63 = vpop.f32.mrb[9].mxu1  ;;  %v513_v2 = vadd.f32 %v512_v61, %v1388_v12 }
 0x183   : > { %v964_v0 = vpack.c.bf16 %v479_v60, %v475_v56  ;;  %v516_v1 = vpop.f32.mrb[10].mxu1  ;;  %v515_v6 = vadd.f32 %v514_v63, %v1390_v4 }
 0x184   : > { %992 = vst [vmem:[%s1398_s6 + $0x20] sm:$0xff] %v924_v62   ;;  %v517_v3 = vadd.f32 %v516_v1, %v1388_v12  ;;  %v518_v5 = vpop.f32.mrb[11].mxu1 }
 0x185   : > { %1000 = vst [vmem:[%s1398_s6 + $0x28] sm:$0xff] %v964_v0   ;;  %v519_v7 = vadd.f32 %v518_v5, %v1390_v4  ;;  %v482_v8 = vpop.f32.mrb[12].mxu0 }
 0x186   : > { %v944_v9 = vpack.c.bf16 %v517_v3, %v513_v2  ;;  %v483_v10 = vadd.f32 %v482_v8, %v1388_v12  ;;  %v484_v11 = vpop.f32.mrb[13].mxu0 }
 0x187   : > { %v984_v13 = vpack.c.bf16 %v519_v7, %v515_v6  ;;  %v485_v14 = vadd.f32 %v484_v11, %v1390_v4  ;;  %v486_v15 = vpop.f32.mrb[14].mxu0 }
 0x188   : > { %996 = vst [vmem:[%s1398_s6 + $0x60] sm:$0xff] %v944_v9   ;;  %v487_v16 = vadd.f32 %v486_v15, %v1388_v12  ;;  %v488_v17 = vpop.f32.mrb[15].mxu0 }
 0x189   : > { %1004 = vst [vmem:[%s1398_s6 + $0x68] sm:$0xff] %v984_v13   ;;  %v489_v18 = vadd.f32 %v488_v17, %v1390_v4  ;;  %v522_v19 = vpop.f32.mrb[12].mxu1 }
 0x18a   : > { %v929_v20 = vpack.c.bf16 %v487_v16, %v483_v10  ;;  %v524_v21 = vpop.f32.mrb[13].mxu1  ;;  %v523_v24 = vadd.f32 %v522_v19, %v1388_v12 }
 0x18b   : > { %v969_v22 = vpack.c.bf16 %v489_v18, %v485_v14  ;;  %v526_v23 = vpop.f32.mrb[14].mxu1  ;;  %v525_v27 = vadd.f32 %v524_v21, %v1390_v4 }
 0x18c   : > { %993 = vst [vmem:[%s1398_s6 + $0x30] sm:$0xff] %v929_v20   ;;  %v527_v25 = vadd.f32 %v526_v23, %v1388_v12  ;;  %v528_v26 = vpop.f32.mrb[15].mxu1 }
 0x18d   : > { %1001 = vst [vmem:[%s1398_s6 + $0x38] sm:$0xff] %v969_v22   ;;  %v529_v28 = vadd.f32 %v528_v26, %v1390_v4 }
 0x18e   : > { %v949_v29 = vpack.c.bf16 %v527_v25, %v523_v24 }
 0x18f   : > { %v989_v30 = vpack.c.bf16 %v529_v28, %v525_v27 }
 0x190   : > { %997 = vst [vmem:[%s1398_s6 + $0x70] sm:$0xff] %v949_v29  }
 0x191   : > { %1005 = vst [vmem:[%s1398_s6 + $0x78] sm:$0xff] %v989_v30  }
 0x192   : > { %1105 = shalt.err (!%p1102_p7)
}
 0x193   : > { %s1106_s4 = scalar_lea.hbm %s1448_s20, 2048  ;;  %s1110_s8 = scalar_lea.hbm %s1512_s3, 8192 }
 0x194   : > { %p1107_p9 = scmp.ne.s32.totalorder %s1448_s20, %s1106_s4  ;;  %p1111_p12 = scmp.lt.u32.totalorder %s1448_s20, %s1512_s3 }
 0x195   : > { %p1112_p13 = scmp.lt.u32.totalorder %s1110_s8, %s1106_s4  ;;  %p1114_p1 = scmp.lt.u32.totalorder %s1106_s4, %s1448_s20 }
 0x196   : > { %p1108_p10 = pnand %p1107_p9, %p1263_p3 }
 0x197   : > { %p1113_p0 = por %p1112_p13, %p1111_p12 }
 0x198   : > { %p1109_p11 = pneg %p1108_p10 }
 0x199   : > { %p1115_p2 = por %p1114_p1, %p1113_p0 }
 0x19b   : > { %p1116_p4 = pnand %p1115_p2, %p1109_p11 }
 0x19d   : > { %1119 = shalt.err (!%p1116_p4)
}
 0x19e   : > { %s1191_s10 = smov 64  }
 0x19f   : > { %1008 = dma.vmem_to_hbm [thread:$0]  (%p1263_p3), %s1450_s16, 2048, %s1448_s20, %s1456_s21, %s1191_s10, %s1191_s10, %s1189_s27  }
 0x1a0 PF: > { %p1014_p5 = scmp.ge.s32.totalorder %s1186_s19, 2  ;;  %s724_s11 = sand.u32 1, %s1158_s12  }
 0x1a1   : > { %s725_s24 = scalar_lea.sflag [#allocation3], %s724_s11 }
 0x1a2   : > { %p1011_p6 = pnand %p1014_p5, %p1272_p8 }
 0x1a4   : > { %1153 = dma.done.wait (!%p1011_p6), %s725_s24, 2048  }
 0x1a5   : > { %1155 = vsyncadd (!%p1011_p6), %s725_s24, 4294965248  ;;  %s16_s19 = sadd.s32 1, %s1186_s19   ;;  %s1517_s12 = smov %s1162_s13 }
 0x1a6   : > { %p13_p7 = scmp.ge.s32.totalorder %s16_s19, 6   ;;  %s1518_s13 = smov %s1166_s14 }
 0x1a7   : > { %s1519_s14 = smov %s1281_s30  ;;  %s1520_s15 = smov %s1178_s17 }
 0x1a8   : > { %s1521_s16 = smov %s1182_s18  ;;  %s1522_s17 = smov %s1525_s22 }
 0x1a9   : > { %s1523_s18 = smov %s1529_s23  ;;  %15 = sbr.rel (!%p13_p7) target bundleno = 5 (0x5), region = 68 }
 0x1b0   :  { %730 = vsyncpa [#allocation3], 1 }
 0x1b1   :  { %732 = vsyncpa [#allocation3 + $0x1], 1 }

</bundles_post_ra>
